<compile_context>
chip_gen: v6e
topology: v6e:2x2x1
jax: 0.10.0
libtpu: 0.0.40
codegen_flags: <defaults>
</compile_context>

<pallas_src>
import functools

import jax
import jax.numpy as jnp
from jax.experimental import pallas as pl
from jax.experimental.pallas import tpu as pltpu


def _monotone_kernel(m, x_ref, w_ref, c_ref, o_ref):
    x = x_ref[...]                                                    # [tile_n, Dp] f32
    y = jnp.dot(x, w_ref[...], preferred_element_type=jnp.float32)   # single MXU pass
    o_ref[...] = (1.0 - m) * x + y + c_ref[...]                      # VPU combine, f32


def linear_monotone_forward(x, w_a, b_a, w_b, b_b, m, *, max_block_rows=256):
    """x: [N, D] f32; w_*: [D, D] (torch nn.Linear layout, spectral-normed); b_*: [D]."""
    n, d = x.shape

    # --- Fold the affine layer once (plain JAX; runs on parameters, not per row). ---
    wat = w_a.T
    fold_m = -(wat @ wat)                       # x @ W_B.T terms cancel exactly
    fold_c = (b_b - b_a @ wat).reshape(1, d)

    # --- Lane-dense padding: features -> multiple of 128, rows -> multiple of tile. ---
    dp = pl.cdiv(d, 128) * 128
    tile_n = min(max_block_rows, pl.cdiv(n, 8) * 8)
    n_pad = pl.cdiv(n, tile_n) * tile_n

    x_p = jnp.pad(x, ((0, n_pad - n), (0, dp - d)))
    m_p = jnp.pad(fold_m, ((0, dp - d), (0, dp - d)))
    c_p = jnp.pad(fold_c, ((0, 0), (0, dp - d)))

    kernel = functools.partial(_monotone_kernel, float(m))
    out = pl.pallas_call(
        kernel,
        out_shape=jax.ShapeDtypeStruct((n_pad, dp), jnp.float32),
        grid=(n_pad // tile_n,),
        in_specs=[
            pl.BlockSpec((tile_n, dp), lambda i: (i, 0)),   # x row tile
            pl.BlockSpec((dp, dp), lambda i: (0, 0)),       # folded weight (VMEM-resident)
            pl.BlockSpec((1, dp), lambda i: (0, 0)),        # folded bias   (VMEM-resident)
        ],
        out_specs=pl.BlockSpec((tile_n, dp), lambda i: (i, 0)),
        compiler_params=pltpu.CompilerParams(
            dimension_semantics=("parallel",)),             # v7x: shard row tiles over both TCs
    )(x_p, m_p, c_p)
    return out[:n, :d]


def spectral_normalize(w, key, n_power_iterations=10, eps=1e-12):
    """Deterministic emulation of torch.nn.utils.spectral_norm: W / sigma."""
    d_out, d_in = w.shape
    u = jax.random.normal(key, (d_out,), dtype=jnp.float32)
    u = u / (jnp.linalg.norm(u) + eps)
    v = jnp.zeros((d_in,), dtype=jnp.float32)
    for _ in range(n_power_iterations):
        v = w.T @ u
        v = v / (jnp.linalg.norm(v) + eps)
        u = w @ v
        u = u / (jnp.linalg.norm(u) + eps)
    sigma = u @ (w @ v)
    return w / sigma


def reference_forward(x, w_a, b_a, w_b, b_b, m):
    """Literal JAX transcription of LinearMonotoneLayer.forward."""
    apply_transpose = lambda z, w: z @ w.T      # torch.mm(z, w.t())
    ax = x @ w_a.T + b_a                        # A(x)
    bx = x @ w_b.T + b_b                        # B(x)
    return (1.0 - m) * x - apply_transpose(ax, w_a) + bx - apply_transpose(x, w_b)


if __name__ == "__main__":
    key = jax.random.PRNGKey(0)
    k_wa, k_ba, k_wb, k_bb, k_x, k_ua, k_ub = jax.random.split(key, 7)

    input_dim = 32
    batch = 8
    m = 0.05  # monotonicity_param

    # torch.nn.Linear default init: U(-1/sqrt(in), 1/sqrt(in)) for weight & bias.
    bound = 1.0 / (input_dim ** 0.5)
    w_a_raw = jax.random.uniform(k_wa, (input_dim, input_dim), jnp.float32, -bound, bound)
    b_a = jax.random.uniform(k_ba, (input_dim,), jnp.float32, -bound, bound)
    w_b_raw = jax.random.uniform(k_wb, (input_dim, input_dim), jnp.float32, -bound, bound)
    b_b = jax.random.uniform(k_bb, (input_dim,), jnp.float32, -bound, bound)

    # Spectral norm (parameter setup, plain JAX glue).
    w_a = spectral_normalize(w_a_raw, k_ua)
    w_b = spectral_normalize(w_b_raw, k_ub)

    x = jax.random.normal(k_x, (batch, input_dim), dtype=jnp.float32)

    out = linear_monotone_forward(x, w_a, b_a, w_b, b_b, m)
    out = jax.block_until_ready(out)

    ref = reference_forward(x, w_a, b_a, w_b, b_b, m)
    assert out.shape == (batch, input_dim)
    assert jnp.allclose(out, ref, atol=1e-5, rtol=1e-5), "mismatch vs reference"

    print("KERNEL_OK")
</pallas_src>

<mosaic_0001>
module attributes {stable_mosaic.version = 11 : i64} {
  func.func @_monotone_kernel(%arg0: i32, %arg1: memref<8x128xf32, #tpu.memory_space<vmem>>, %arg2: memref<128x128xf32, #tpu.memory_space<vmem>>, %arg3: memref<1x128xf32, #tpu.memory_space<vmem>>, %arg4: memref<8x128xf32, #tpu.memory_space<vmem>>) attributes {dimension_semantics = [#tpu.dimension_semantics<parallel>], iteration_bounds = array<i64: 1>, scalar_prefetch = 0 : i64, scratch_operands = 0 : i64, tpu.core_type = #tpu.core_type<tc>, window_params = [{transform_indices = @transform_0, window_bounds = array<i64: 8, 128>}, {pipeline_mode = #tpu.pipeline_mode<synchronous>, transform_indices = @transform_1, window_bounds = array<i64: 128, 128>}, {pipeline_mode = #tpu.pipeline_mode<synchronous>, transform_indices = @transform_2, window_bounds = array<i64: 1, 128>}, {transform_indices = @transform_3, window_bounds = array<i64: 8, 128>}]} {
    %c0 = arith.constant 0 : index
    %c0_0 = arith.constant 0 : index
    %0 = vector.load %arg1[%c0, %c0_0] : memref<8x128xf32, #tpu.memory_space<vmem>>, vector<8x128xf32>
    %c0_1 = arith.constant 0 : index
    %c0_2 = arith.constant 0 : index
    %1 = vector.load %arg2[%c0_1, %c0_2] : memref<128x128xf32, #tpu.memory_space<vmem>>, vector<128x128xf32>
    %cst = arith.constant dense<0.000000e+00> : vector<8x128xf32>
    %2 = tpu.matmul %0, %1, %cst {dimension_numbers = #tpu.dot_dimension_numbers<[1], [0], [0], [1], [0, 0, 1, 1], [], []>} : vector<8x128xf32>, vector<128x128xf32>, vector<8x128xf32> -> vector<8x128xf32>
    %cst_3 = arith.constant 0.949999988 : f32
    %3 = vector.broadcast %cst_3 : f32 to vector<8x128xf32>
    %4 = arith.mulf %3, %0 : vector<8x128xf32>
    %5 = arith.addf %4, %2 : vector<8x128xf32>
    %c0_4 = arith.constant 0 : index
    %c0_5 = arith.constant 0 : index
    %6 = vector.load %arg3[%c0_4, %c0_5] : memref<1x128xf32, #tpu.memory_space<vmem>>, vector<1x128xf32>
    %7 = vector.broadcast %6 : vector<1x128xf32> to vector<8x128xf32>
    %8 = arith.addf %5, %7 : vector<8x128xf32>
    %c0_6 = arith.constant 0 : index
    %c0_7 = arith.constant 0 : index
    %9 = vector.load %arg4[%c0_6, %c0_7] : memref<8x128xf32, #tpu.memory_space<vmem>>, vector<8x128xf32>
    tpu.vector_store %arg4[%c0_6, %c0_7], %8 {strides = array<i32>} : memref<8x128xf32, #tpu.memory_space<vmem>>, vector<8x128xf32>,
    return
  }
  func.func @transform_0(%arg0: i32) -> (i32, i32) {
    %c0_i32 = arith.constant 0 : i32
    %c0_i32_0 = arith.constant 0 : i32
    return %arg0, %c0_i32 : i32, i32
  }
  func.func @transform_1(%arg0: i32) -> (i32, i32) {
    %c0_i32 = arith.constant 0 : i32
    %c0_i32_0 = arith.constant 0 : i32
    %c0_i32_1 = arith.constant 0 : i32
    return %c0_i32, %c0_i32_0 : i32, i32
  }
  func.func @transform_2(%arg0: i32) -> (i32, i32) {
    %c0_i32 = arith.constant 0 : i32
    %c0_i32_0 = arith.constant 0 : i32
    %c0_i32_1 = arith.constant 0 : i32
    return %c0_i32, %c0_i32_0 : i32, i32
  }
  func.func @transform_3(%arg0: i32) -> (i32, i32) {
    %c0_i32 = arith.constant 0 : i32
    %c0_i32_0 = arith.constant 0 : i32
    return %arg0, %c0_i32 : i32, i32
  }
}

</mosaic_0001>

<bundles_post_ra>
// kernel: tpu_custom_call.1
= control target key start
LH: loop header
LB: loop body
LE: loop exit
PB: predicated region body
PF: predicated region fallthrough
CT: control target
= control target key end

     0   :  { %8 = vsyncpa [#allocation3], 0  ;;  %s320_s0 = inlined_call_operand.hbm [shape: f32[8,128], index: 0, kind: input, shape index: {}]   ;;  %s321_s1 = inlined_call_operand.hbm [shape: f32[128,128], index: 1, kind: input, shape index: {}]   ;;  %s322_s2 = inlined_call_operand.vmem [shape: f32[1,128], index: 2, kind: input, shape index: {}]   ;;  %s323_s3 = inlined_call_operand.hbm [shape: f32[8,128], index: 3, kind: output, shape index: {}]  }
   0x1   :  { %9 = vsyncpa [#allocation6], 0 }
   0x2   :  { %10 = vsyncpa [#allocation4], 0  ;;  %s281_s12 = smov [#allocation2]   ;;  %s282_s14 = smov [#allocation5]  }
   0x3   :  { %s17_s13 = sshll.u32 %s281_s12, 4  ;;  %s26_s15 = sshll.u32 %s282_s14, 4  ;;  %s18_s13 = int_to_ptr.vmem [resolvable:$true] %s17_s13  ;;  %s27_s15 = int_to_ptr.vmem [resolvable:$true] %s26_s15 }
   0x4   :  { %s223_s16 = scalar_lea.vmem %s18_s13, 128  ;;  %p228_p1 = scmp.lt.s32.totalorder %s18_s13, %s18_s13 }
   0x5   :  { %p224_p0 = scmp.ne.s32.totalorder %s18_s13, %s223_s16  ;;  %p229_p2 = scmp.lt.s32.totalorder %s223_s16, %s223_s16 }
   0x7   :  { %p230_p3 = por %p229_p2, %p228_p1 }
   0x9   :  { %p231_p4 = pnand %p230_p3, %p224_p0 }
   0xb   :  { %234 = shalt.err (!%p231_p4)
}
   0xc   :  { %20 = dma.hbm_to_vmem [thread:$0]  %s320_s0, 128, %s18_s13, [#allocation3]  }
   0xd   :  { %s243_s19 = scalar_lea.vmem %s27_s15, 2048  ;;  %p248_p6 = scmp.lt.s32.totalorder %s27_s15, %s27_s15 }
   0xe   :  { %p244_p5 = scmp.ne.s32.totalorder %s27_s15, %s243_s19  ;;  %p249_p7 = scmp.lt.s32.totalorder %s243_s19, %s243_s19 }
  0x10   :  { %p250_p8 = por %p249_p7, %p248_p6 }
  0x12   :  { %p251_p9 = pnand %p250_p8, %p244_p5 }
  0x14   :  { %254 = shalt.err (!%p251_p9)
}
  0x15   :  { %s283_s20 = smov 128   ;;  %s284_s21 = smov 8  }
  0x16   :  { %32 = dma.hbm_to_vmem [thread:$0]  %s321_s1, 2048, %s27_s15, [#allocation6], %s283_s20, %s283_s20, %s284_s21  }
  0x17   :  { %275 = dma.done.wait [#allocation3], 128  }
  0x18   :  { %276 = vsyncadd [#allocation3], 4294967168 }
  0x19   :  { %277 = dma.done.wait [#allocation6], 2048  }
  0x1a   :  { %278 = vsyncadd [#allocation6], 4294965248  ;;  %v285_v0 = vmov 0.0   ;;  %vm286_vm0 = vmmov 0   ;;  %v57_v1 = vld [vmem:[#allocation5 + $0x78] sm:$0xff]  ;;  %v56_v2 = vld [vmem:[#allocation5 + $0x70] sm:$0xff] }
  0x1b   :  { %173 = vmatprep.subr.mxu0 %v285_v0  ;;  %205 = vmatprep.mubr.msk.f32.mxu0 %vm286_vm0, %v285_v0  ;;  %v55_v3 = vld [vmem:[#allocation5 + $0x68] sm:$0xff]  ;;  %v54_v4 = vld [vmem:[#allocation5 + $0x60] sm:$0xff]  ;;  %v53_v5 = vld [vmem:[#allocation5 + $0x58] sm:$0xff]  ;;  %s287_s24 = smov [#allocation7]  }
  0x1c   :  { %174 = vmatpush3.msra.mxu0 %v57_v1  ;;  %v52_v6 = vld [vmem:[#allocation5 + $0x50] sm:$0xff]  ;;  %v51_v7 = vld [vmem:[#allocation5 + $0x48] sm:$0xff]  ;;  %v50_v8 = vld [vmem:[#allocation5 + $0x40] sm:$0xff]  ;;  %s145_s25 = sshll.u32 %s287_s24, 4  ;;  %s146_s25 = int_to_ptr.vmem [resolvable:$true] %s145_s25 }
  0x1d   :  { %175 = vmatprep.subr.mxu0 %v285_v0  ;;  %v49_v9 = vld [vmem:[#allocation5 + $0x38] sm:$0xff]  ;;  %v48_v10 = vld [vmem:[#allocation5 + $0x30] sm:$0xff]  ;;  %v47_v11 = vld [vmem:[#allocation5 + $0x28] sm:$0xff]  ;;  %s255_s26 = scalar_lea.vmem %s146_s25, 128  ;;  %p260_p11 = scmp.lt.s32.totalorder %s146_s25, %s146_s25 }
  0x1e   :  { %176 = vmatpush3.msra.mxu0 %v56_v2  ;;  %v46_v12 = vld [vmem:[#allocation5 + $0x20] sm:$0xff]  ;;  %v45_v13 = vld [vmem:[#allocation5 + $0x18] sm:$0xff]  ;;  %v44_v14 = vld [vmem:[#allocation5 + $0x10] sm:$0xff]  ;;  %p256_p10 = scmp.ne.s32.totalorder %s146_s25, %s255_s26  ;;  %p261_p12 = scmp.lt.s32.totalorder %s255_s26, %s255_s26 }
  0x1f   :  { %177 = vmatprep.subr.mxu0 %v285_v0  ;;  %v43_v15 = vld [vmem:[#allocation5 + $0x8] sm:$0xff]  ;;  %v42_v16 = vld [vmem:[#allocation5] sm:$0xff]  ;;  %v41_v17 = vld [vmem:[#allocation2] sm:$0xff] }
  0x20   :  { %178 = vmatpush3.msra.mxu0 %v55_v3  ;;  %v128_v18 = vmul.f32 0.95, %v41_v17  ;;  %v155_v20 = vld [vmem:[%s322_s2] ss:$0 sm:$0xff]  ;;  %p262_p13 = por %p261_p12, %p260_p11 }
  0x21   :  { %179 = vmatprep.subr.mxu0 %v285_v0 }
  0x22   :  { %180 = vmatpush3.msra.mxu0 %v54_v4  ;;  %p263_p0 = pnand %p262_p13, %p256_p10 }
  0x23   :  { %181 = vmatprep.subr.mxu0 %v285_v0 }
  0x24   :  { %182 = vmatpush3.msra.mxu0 %v53_v5 }
  0x25   :  { %183 = vmatprep.subr.mxu0 %v285_v0 }
  0x26   :  { %184 = vmatpush3.msra.mxu0 %v52_v6 }
  0x27   :  { %185 = vmatprep.subr.mxu0 %v285_v0 }
  0x28   :  { %186 = vmatpush3.msra.mxu0 %v51_v7 }
  0x29   :  { %187 = vmatprep.subr.mxu0 %v285_v0 }
  0x2a   :  { %188 = vmatpush3.msra.mxu0 %v50_v8 }
  0x2b   :  { %189 = vmatprep.subr.mxu0 %v285_v0 }
  0x2c   :  { %190 = vmatpush3.msra.mxu0 %v49_v9 }
  0x2d   :  { %191 = vmatprep.subr.mxu0 %v285_v0 }
  0x2e   :  { %192 = vmatpush3.msra.mxu0 %v48_v10 }
  0x2f   :  { %193 = vmatprep.subr.mxu0 %v285_v0 }
  0x30   :  { %194 = vmatpush3.msra.mxu0 %v47_v11 }
  0x31   :  { %195 = vmatprep.subr.mxu0 %v285_v0 }
  0x32   :  { %196 = vmatpush3.msra.mxu0 %v46_v12 }
  0x33   :  { %197 = vmatprep.subr.mxu0 %v285_v0 }
  0x34   :  { %198 = vmatpush3.msra.mxu0 %v45_v13 }
  0x35   :  { %199 = vmatprep.subr.mxu0 %v285_v0 }
  0x36   :  { %200 = vmatpush3.msra.mxu0 %v44_v14 }
  0x37   :  { %201 = vmatprep.subr.mxu0 %v285_v0 }
  0x38   :  { %202 = vmatpush3.msra.mxu0 %v43_v15 }
  0x39   :  { %203 = vmatprep.subr.mxu0 %v285_v0 }
  0x3a   :  { %204 = vmatpush3.msra.mxu0 %v42_v16 }
  0x3b   :  { %206 = vmatmul.mubr.f32.vlgmr.msra.gmra.mxu0 %v41_v17 }
  0xfb   :  { %v124_v19 = vpop.f32.mrf.mxu0 }
  0xfc   :  { %v129_v21 = vadd.f32 %v128_v18, %v124_v19 }
  0xfd   :  { %v207_v22 = vpop.f32.mrf.mxu0 }
  0xfe   :  { %v137_v23 = vadd.f32 %v155_v20, %v129_v21 }
 0x100   :  { %138 = vst [vmem:[#allocation7] sm:$0xff] %v137_v23 }
 0x101   :  { %266 = shalt.err (!%p263_p0)
}
 0x102   :  { %148 = dma.vmem_to_hbm [thread:$0]  %s146_s25, 128, %s323_s3, [#allocation4]  }
 0x103   :  { %279 = dma.done.wait [#allocation4], 128  }
 0x104   :  { %280 = vsyncadd [#allocation4], 4294967168 }
 0x105   :  { %152 = vsyncpa [#allocation3], 1 }
 0x106   :  { %153 = vsyncpa [#allocation6], 1 }
 0x107   :  { %154 = vsyncpa [#allocation4], 1 }

</bundles_post_ra>
